<compile_context>
chip_gen: v6e
topology: v6e:2x2x1
jax: 0.10.0
libtpu: 0.0.40
codegen_flags: <defaults>
</compile_context>

<pallas_src>
import functools

import jax
import jax.numpy as jnp
from jax.experimental import pallas as pl
from jax.experimental.pallas import tpu as pltpu

LANE = 128
SUBLANE = 8


def _round_up(n, m):
    return ((n + m - 1) // m) * m


def _linear_relu_kernel(x_ref, w_ref, b_ref, o_ref):
    # x_ref: (TB, D_in) batch tile
    # w_ref: (D_in, D_out) resident pre-transposed weight
    # b_ref: (1, D_out)    resident bias
    # o_ref: (TB, D_out)   unpadded output tile (last dim == full array dim)
    x = x_ref[...]
    w = w_ref[...]
    if x.dtype != w.dtype:           # static (trace-time) branch
        x = x.astype(w.dtype)        # bf16 params -> bf16 MXU operands
    acc = jnp.dot(x, w, preferred_element_type=jnp.float32)   # f32 MXU accumulate
    acc = acc + b_ref[...].astype(jnp.float32)                # f32 epilogue (v5e-safe)
    o_ref[...] = jnp.maximum(acc, 0.0).astype(o_ref.dtype)


def prepare_latent_vad_params(weight, bias, param_dtype=None):
    """One-time parameter prep (call at init time, NOT per forward).

    weight: (D_out, D_in) in PyTorch nn.Linear layout; bias: (D_out,).
    param_dtype: optionally jnp.bfloat16 on v6e/v7x to halve weight HBM traffic.
    Returns:
      w_t : (D_in, D_out) — weight.T (no per-call transpose, no lane padding).
      b2d : (1, D_out)    — bias as a row vector.
    """
    w_t = jnp.asarray(weight).T
    b2d = jnp.asarray(bias)[None, :]
    if param_dtype is not None:
        w_t = w_t.astype(param_dtype)
        b2d = b2d.astype(param_dtype)
    return w_t, b2d


@functools.partial(
    jax.jit, static_argnames=("batch_tile", "small_b_threshold", "force_pallas")
)
def latent_vad_forward(x, w_t, b2d, *, batch_tile=8192, small_b_threshold=2048,
                       force_pallas=False):
    """relu(fc1(x)) == relu(x @ w_t + b2d).

    x   : (B, D_in)
    w_t : (D_in, D_out) from prepare_latent_vad_params
    b2d : (1, D_out)    from prepare_latent_vad_params
    """
    B, d_in = x.shape
    d_in_w, d_out = w_t.shape
    assert d_in == d_in_w
    out_dtype = x.dtype

    # Small-B fallback: fused XLA is strictly faster than a standalone pallas_call
    # when the total work is a few microseconds.
    if (B < small_b_threshold) and not force_pallas:
        acc = jnp.dot(x.astype(w_t.dtype), w_t, preferred_element_type=jnp.float32)
        return jnp.maximum(acc + b2d.astype(jnp.float32), 0.0).astype(out_dtype)

    # Batch tile: big enough to amortize per-grid-step overhead, capped so the grid
    # has >=2 steps when possible (megacore sharding on v7x), sublane-aligned.
    tb = min(batch_tile, _round_up(max(pl.cdiv(B, 2), 1), SUBLANE))
    tb = max(tb, SUBLANE)
    grid = (pl.cdiv(B, tb),)   # ragged edge handled by edge-block semantics

    # Explicit VMEM budget: double-buffered x + out tiles (last dim lane-padded to
    # 128 physically) + resident W/bias, with headroom. Avoids v5e's 16 MiB default
    # scoped-VMEM limit clamping large tiles.
    x_tile_bytes = tb * _round_up(d_in, LANE) * x.dtype.itemsize
    o_tile_bytes = tb * _round_up(d_out, LANE) * jnp.dtype(out_dtype).itemsize
    w_bytes = _round_up(d_in, SUBLANE) * _round_up(d_out, LANE) * w_t.dtype.itemsize
    b_bytes = SUBLANE * _round_up(d_out, LANE) * b2d.dtype.itemsize
    vmem_needed = 2 * (x_tile_bytes + o_tile_bytes) + 2 * (w_bytes + b_bytes)
    vmem_limit = int(min(112 * (1 << 20), max(vmem_needed + (2 << 20), 16 << 20)))

    out = pl.pallas_call(
        _linear_relu_kernel,
        out_shape=jax.ShapeDtypeStruct((B, d_out), out_dtype),
        grid_spec=pltpu.PrefetchScalarGridSpec(
            num_scalar_prefetch=0,
            grid=grid,
            in_specs=[
                pl.BlockSpec((tb, d_in), lambda i: (i, 0)),     # x: tiled over batch
                pl.BlockSpec((d_in, d_out), lambda i: (0, 0)),  # W: single resident block
                pl.BlockSpec((1, d_out), lambda i: (0, 0)),     # bias: single resident block
            ],
            out_specs=pl.BlockSpec((tb, d_out), lambda i: (i, 0)),
        ),
        compiler_params=pltpu.CompilerParams(
            # Batch tiles are independent -> allow megacore sharding (v7x: 2 TCs).
            dimension_semantics=("parallel",),
            vmem_limit_bytes=vmem_limit,
        ),
    )(x, w_t, b2d)

    return out


if __name__ == "__main__":
    # Small shapes consistent with LatentVAD(input_dim=32, hidden_dim=64, output_dim=32);
    # hidden_dim is unused by the module's forward.
    B, input_dim, hidden_dim, output_dim = 8, 32, 64, 32

    key = jax.random.PRNGKey(0)
    kx, kw, kb = jax.random.split(key, 3)

    x = jax.random.normal(kx, (B, input_dim), dtype=jnp.float32)
    # Deterministic parameter init (uniform like nn.Linear's default, bounded by 1/sqrt(fan_in))
    bound = 1.0 / (input_dim ** 0.5)
    weight = jax.random.uniform(kw, (output_dim, input_dim), minval=-bound, maxval=bound,
                                dtype=jnp.float32)
    bias = jax.random.uniform(kb, (output_dim,), minval=-bound, maxval=bound,
                              dtype=jnp.float32)

    # One-time parameter prep (transpose only; f32 here so the 1e-5 check is valid.
    # On v6e/v7x pass param_dtype=jnp.bfloat16 and loosen the tolerance.)
    w_t, b2d = prepare_latent_vad_params(weight, bias)

    # force_pallas=True so the demo actually exercises the Pallas kernel even at B=8
    # (the production path would take the XLA fallback at this size).
    out = latent_vad_forward(x, w_t, b2d, force_pallas=True)
    out = jax.block_until_ready(out)

    # Reference check against plain JAX (same math as F.relu(fc1(x)))
    ref = jnp.maximum(x @ weight.T + bias, 0.0)
    assert out.shape == (B, output_dim)
    assert jnp.allclose(out, ref, atol=1e-5, rtol=1e-5)

    # Also sanity-check the small-B XLA fallback path.
    out_fb = jax.block_until_ready(latent_vad_forward(x, w_t, b2d))
    assert jnp.allclose(out_fb, ref, atol=1e-5, rtol=1e-5)

    print("KERNEL_OK")
</pallas_src>

<mosaic_0001>
module attributes {stable_mosaic.version = 11 : i64} {
  func.func @_linear_relu_kernel(%arg0: i32, %arg1: memref<8x32xf32, #tpu.memory_space<vmem>>, %arg2: memref<32x32xf32, #tpu.memory_space<vmem>>, %arg3: memref<1x32xf32, #tpu.memory_space<vmem>>, %arg4: memref<8x32xf32, #tpu.memory_space<vmem>>) attributes {dimension_semantics = [#tpu.dimension_semantics<parallel>], iteration_bounds = array<i64: 1>, scalar_prefetch = 0 : i64, scratch_operands = 0 : i64, tpu.core_type = #tpu.core_type<tc>, window_params = [{transform_indices = @transform_0, window_bounds = array<i64: 8, 32>}, {pipeline_mode = #tpu.pipeline_mode<synchronous>, transform_indices = @transform_1, window_bounds = array<i64: 32, 32>}, {pipeline_mode = #tpu.pipeline_mode<synchronous>, transform_indices = @transform_2, window_bounds = array<i64: 1, 32>}, {transform_indices = @transform_3, window_bounds = array<i64: 8, 32>}]} {
    %c0 = arith.constant 0 : index
    %c0_0 = arith.constant 0 : index
    %0 = vector.load %arg1[%c0, %c0_0] : memref<8x32xf32, #tpu.memory_space<vmem>>, vector<8x32xf32>
    %c0_1 = arith.constant 0 : index
    %c0_2 = arith.constant 0 : index
    %1 = vector.load %arg2[%c0_1, %c0_2] : memref<32x32xf32, #tpu.memory_space<vmem>>, vector<32x32xf32>
    %cst = arith.constant dense<0.000000e+00> : vector<8x32xf32>
    %2 = tpu.matmul %0, %1, %cst {dimension_numbers = #tpu.dot_dimension_numbers<[1], [0], [0], [1], [0, 0, 1, 1], [], []>} : vector<8x32xf32>, vector<32x32xf32>, vector<8x32xf32> -> vector<8x32xf32>
    %c0_3 = arith.constant 0 : index
    %c0_4 = arith.constant 0 : index
    %3 = vector.load %arg3[%c0_3, %c0_4] : memref<1x32xf32, #tpu.memory_space<vmem>>, vector<1x32xf32>
    %4 = vector.broadcast %3 : vector<1x32xf32> to vector<8x32xf32>
    %5 = arith.addf %2, %4 : vector<8x32xf32>
    %cst_5 = arith.constant 0.000000e+00 : f32
    %6 = vector.broadcast %cst_5 : f32 to vector<8x32xf32>
    %7 = arith.maximumf %5, %6 : vector<8x32xf32>
    %c0_6 = arith.constant 0 : index
    %c0_7 = arith.constant 0 : index
    %8 = vector.load %arg4[%c0_6, %c0_7] : memref<8x32xf32, #tpu.memory_space<vmem>>, vector<8x32xf32>
    tpu.vector_store %arg4[%c0_6, %c0_7], %7 {strides = array<i32>} : memref<8x32xf32, #tpu.memory_space<vmem>>, vector<8x32xf32>,
    return
  }
  func.func @transform_0(%arg0: i32) -> (i32, i32) {
    %c0_i32 = arith.constant 0 : i32
    %c0_i32_0 = arith.constant 0 : i32
    return %arg0, %c0_i32 : i32, i32
  }
  func.func @transform_1(%arg0: i32) -> (i32, i32) {
    %c0_i32 = arith.constant 0 : i32
    %c0_i32_0 = arith.constant 0 : i32
    %c0_i32_1 = arith.constant 0 : i32
    return %c0_i32, %c0_i32_0 : i32, i32
  }
  func.func @transform_2(%arg0: i32) -> (i32, i32) {
    %c0_i32 = arith.constant 0 : i32
    %c0_i32_0 = arith.constant 0 : i32
    %c0_i32_1 = arith.constant 0 : i32
    return %c0_i32, %c0_i32_0 : i32, i32
  }
  func.func @transform_3(%arg0: i32) -> (i32, i32) {
    %c0_i32 = arith.constant 0 : i32
    %c0_i32_0 = arith.constant 0 : i32
    return %arg0, %c0_i32 : i32, i32
  }
}

</mosaic_0001>

<bundles_post_ra>
// kernel: latent_vad_forward.1
= control target key start
LH: loop header
LB: loop body
LE: loop exit
PB: predicated region body
PF: predicated region fallthrough
CT: control target
= control target key end

     0   :  { %8 = vsyncpa [#allocation3], 0  ;;  %s275_s0 = inlined_call_operand.hbm [shape: f32[8,32], index: 0, kind: input, shape index: {}]   ;;  %s276_s1 = inlined_call_operand.hbm [shape: f32[32,32], index: 1, kind: input, shape index: {}]   ;;  %s277_s2 = inlined_call_operand.vmem [shape: f32[1,32], index: 2, kind: input, shape index: {}]   ;;  %s278_s3 = inlined_call_operand.hbm [shape: f32[8,32], index: 3, kind: output, shape index: {}]  }
   0x1   :  { %9 = vsyncpa [#allocation6], 0 }
   0x2   :  { %10 = vsyncpa [#allocation4], 0  ;;  %s236_s12 = smov [#allocation2]   ;;  %s237_s14 = smov [#allocation5]  }
   0x3   :  { %s17_s13 = sshll.u32 %s236_s12, 4  ;;  %s26_s15 = sshll.u32 %s237_s14, 4  ;;  %s18_s13 = int_to_ptr.vmem [resolvable:$true] %s17_s13  ;;  %s27_s15 = int_to_ptr.vmem [resolvable:$true] %s26_s15 }
   0x4   :  { %s178_s16 = scalar_lea.vmem %s18_s13, 128  ;;  %p183_p1 = scmp.lt.s32.totalorder %s18_s13, %s18_s13 }
   0x5   :  { %p179_p0 = scmp.ne.s32.totalorder %s18_s13, %s178_s16  ;;  %p184_p2 = scmp.lt.s32.totalorder %s178_s16, %s178_s16 }
   0x7   :  { %p185_p3 = por %p184_p2, %p183_p1 }
   0x9   :  { %p186_p4 = pnand %p185_p3, %p179_p0 }
   0xb   :  { %189 = shalt.err (!%p186_p4)
}
   0xc   :  { %20 = dma.hbm_to_vmem [thread:$0]  %s275_s0, 128, %s18_s13, [#allocation3]  }
   0xd   :  { %s198_s19 = scalar_lea.vmem %s27_s15, 512  ;;  %p203_p6 = scmp.lt.s32.totalorder %s27_s15, %s27_s15 }
   0xe   :  { %p199_p5 = scmp.ne.s32.totalorder %s27_s15, %s198_s19  ;;  %p204_p7 = scmp.lt.s32.totalorder %s198_s19, %s198_s19 }
  0x10   :  { %p205_p8 = por %p204_p7, %p203_p6 }
  0x12   :  { %p206_p9 = pnand %p205_p8, %p199_p5 }
  0x14   :  { %209 = shalt.err (!%p206_p9)
}
  0x15   :  { %s238_s20 = smov 128   ;;  %s239_s21 = smov 8  }
  0x16   :  { %32 = dma.hbm_to_vmem [thread:$0]  %s276_s1, 512, %s27_s15, [#allocation6], %s238_s20, %s238_s20, %s239_s21  }
  0x17   :  { %230 = dma.done.wait [#allocation3], 128  }
  0x18   :  { %231 = vsyncadd [#allocation3], 4294967168 }
  0x19   :  { %232 = dma.done.wait [#allocation6], 512  }
  0x1a   :  { %233 = vsyncadd [#allocation6], 4294966784  ;;  %v240_v0 = vmov 0.0   ;;  %vm241_vm0 = vmmov 0   ;;  %v45_v1 = vld [vmem:[#allocation5 + $0x18] sm:$0xff]  ;;  %v44_v2 = vld [vmem:[#allocation5 + $0x10] sm:$0xff] }
  0x1b   :  { %152 = vmatprep.subr.mxu0 %v240_v0  ;;  %160 = vmatprep.mubr.msk.f32.mxu0 %vm241_vm0, %v240_v0  ;;  %v43_v3 = vld [vmem:[#allocation5 + $0x8] sm:$0xff]  ;;  %v42_v4 = vld [vmem:[#allocation5] sm:$0xff]  ;;  %v41_v5 = vld [vmem:[#allocation2] sm:$0xff]  ;;  %vm53_vm1 = vcmask 261120   ;;  %s242_s24 = smov [#allocation7]  }
  0x1c   :  { %153 = vmatpush3.msra.mxu0 %v45_v1  ;;  %v145_v6 = vld [vmem:[%s277_s2] ss:$0 sm:$0xff]  ;;  %s135_s25 = sshll.u32 %s242_s24, 4  ;;  %s136_s25 = int_to_ptr.vmem [resolvable:$true] %s135_s25 }
  0x1d   :  { %154 = vmatprep.subr.mxu0 %v240_v0  ;;  %s210_s26 = scalar_lea.vmem %s136_s25, 128  ;;  %p215_p11 = scmp.lt.s32.totalorder %s136_s25, %s136_s25 }
  0x1e   :  { %155 = vmatpush3.msra.mxu0 %v44_v2  ;;  %p211_p10 = scmp.ne.s32.totalorder %s136_s25, %s210_s26  ;;  %p216_p12 = scmp.lt.s32.totalorder %s210_s26, %s210_s26 }
  0x1f   :  { %156 = vmatprep.subr.mxu0 %v240_v0 }
  0x20   :  { %157 = vmatpush3.msra.mxu0 %v43_v3  ;;  %p217_p13 = por %p216_p12, %p215_p11 }
  0x21   :  { %158 = vmatprep.subr.mxu0 %v240_v0 }
  0x22   :  { %159 = vmatpush3.msra.mxu0 %v42_v4  ;;  %p218_p0 = pnand %p217_p13, %p211_p10 }
  0x23   :  { %161 = vmatmul.mubr.msk.f32.vlgmr.msra.gmra.mxu0 %vm53_vm1, %v41_v5 }
  0xe3   :  { %v123_v7 = vpop.f32.mrf.mxu0 }
  0xe4   :  { %v124_v8 = vadd.f32 %v145_v6, %v123_v7 }
  0xe5   :  { %v162_v9 = vpop.f32.mrf.mxu0 }
  0xe6   :  { %v127_v10 = vmax.f32 %v124_v8, 0.0 }
  0xe8   :  { %128 = vst.msk [vmem:[#allocation7] sm:$0xff] %vm53_vm1, %v127_v10 }
  0xe9   :  { %221 = shalt.err (!%p218_p0)
}
  0xea   :  { %138 = dma.vmem_to_hbm [thread:$0]  %s136_s25, 128, %s278_s3, [#allocation4]  }
  0xeb   :  { %234 = dma.done.wait [#allocation4], 128  }
  0xec   :  { %235 = vsyncadd [#allocation4], 4294967168 }
  0xed   :  { %142 = vsyncpa [#allocation3], 1 }
  0xee   :  { %143 = vsyncpa [#allocation6], 1 }
  0xef   :  { %144 = vsyncpa [#allocation4], 1 }

</bundles_post_ra>
